<compile_context>
chip_gen: v7x
topology: tpu7x:2x2x1
jax: 0.10.0
libtpu: 0.0.40
codegen_flags: <defaults>
</compile_context>

<pallas_src>
import functools

import jax
import jax.numpy as jnp
from jax.experimental import pallas as pl
from jax.experimental.pallas import tpu as pltpu


def _round_up(x, m):
    return (x + m - 1) // m * m


def _kl_div_block_kernel(x_ref, t_ref, part_ref, *, total_rows, block_rows, num_classes):
    """One (block_rows, C) tile -> (8, C) per-lane partial KL sum."""
    i = pl.program_id(0)

    x = x_ref[...].astype(jnp.float32)
    t = t_ref[...].astype(jnp.float32)

    # Zero out rows past the true batch size (padding of the ragged last block)
    # BEFORE any math, so garbage values cannot turn into NaN/Inf.
    row_ids = (jax.lax.broadcasted_iota(jnp.int32, (block_rows, 1), 0)
               + i * block_rows)
    valid = row_ids < total_rows
    x = jnp.where(valid, x, 0.0)
    t = jnp.where(valid, t, 0.0)

    # Numerically stable log_softmax over the class (lane) axis.
    m = jnp.max(x, axis=-1, keepdims=True)
    z = x - m
    lse = jnp.log(jnp.sum(jnp.exp(z), axis=-1, keepdims=True))
    log_p = z - lse

    # xlogy(t, t): contributes 0 where t <= 0 (PyTorch kl_div convention).
    safe_t = jnp.where(t > 0, t, 1.0)
    xlogy = jnp.where(t > 0, t * jnp.log(safe_t), 0.0)

    loss_elem = jnp.where(valid, xlogy - t * log_p, 0.0)

    # Cheap vreg-wise partial reduce: (block_rows, C) -> (8, C).  The (8, C)
    # minor dims match the native f32 tile, so the reshape is layout-trivial
    # and the sum is plain VALU adds across vregs.
    part = jnp.sum(loss_elem.reshape(block_rows // 8, 8, num_classes), axis=0)
    part_ref[...] = part[None]   # (1, 8, C) full-block, unmasked store


def label_smoothing_kl_div(inp, target, *, block_rows=None,
                           vmem_budget_bytes=16 * 2**20):
    """Pallas implementation of F.kl_div(inp.log_softmax(-1), target, 'batchmean')."""
    assert inp.shape == target.shape and inp.ndim == 2
    B, C = inp.shape
    itemsz = inp.dtype.itemsize + target.dtype.itemsize

    if block_rows is None:
        # 2 pipeline buffers per input; keep the double-buffered footprint inside
        # a budget that is safe on every generation (v7x physical VMEM = 64 MiB).
        rows = max(8, vmem_budget_bytes // max(2 * C * itemsz, 1))
        block_rows = max(8, (int(min(512, rows)) // 8) * 8)
    # Clamp to the (8-padded) batch and force a multiple of 8.
    block_rows = max(8, min(block_rows, _round_up(B, 8)))
    block_rows = _round_up(block_rows, 8)

    grid = pl.cdiv(B, block_rows)

    # Scoped-VMEM limit: cover the double-buffered tiles with headroom, but stay
    # well under v7x's 64 MiB physical VMEM.
    est_bytes = 2 * block_rows * C * itemsz + 2 * 8 * C * 4
    vmem_limit = int(min(max(4 * est_bytes, 16 * 2**20), 48 * 2**20))

    kernel = functools.partial(
        _kl_div_block_kernel,
        total_rows=B, block_rows=block_rows, num_classes=C)

    partials = pl.pallas_call(
        kernel,
        out_shape=jax.ShapeDtypeStruct((grid, 8, C), jnp.float32),
        grid=(grid,),
        in_specs=[
            pl.BlockSpec((block_rows, C), lambda i: (i, 0)),
            pl.BlockSpec((block_rows, C), lambda i: (i, 0)),
        ],
        out_specs=pl.BlockSpec((1, 8, C), lambda i: (i, 0, 0)),
        compiler_params=pltpu.CompilerParams(
            dimension_semantics=("parallel",),
            vmem_limit_bytes=vmem_limit,
        ),
    )(inp, target)

    # Final cross-lane/sublane reduce + 'batchmean' divide by GLOBAL batch size,
    # done exactly once.
    return jnp.sum(partials) / jnp.float32(B)


def _reference(inp, target):
    # Pure-JAX reference for sanity checking.
    log_p = jax.nn.log_softmax(inp.astype(jnp.float32), axis=-1)
    t = target.astype(jnp.float32)
    safe_t = jnp.where(t > 0, t, 1.0)
    xlogy = jnp.where(t > 0, t * jnp.log(safe_t), 0.0)
    return jnp.sum(xlogy - t * log_p) / inp.shape[0]


if __name__ == "__main__":
    key = jax.random.PRNGKey(0)
    k1, k2 = jax.random.split(key)

    # B deliberately NOT a multiple of the row tile to exercise the ragged-tail mask.
    B, C = 30, 128
    x = jax.random.normal(k1, (B, C), dtype=jnp.float32)
    t = jax.nn.softmax(jax.random.normal(k2, (B, C), dtype=jnp.float32), axis=-1)

    ref = jax.block_until_ready(_reference(x, t))

    # Multi-block grid (block_rows=8 -> grid of 4, last block has 6 valid rows).
    loss_tiled = jax.block_until_ready(label_smoothing_kl_div(x, t, block_rows=8))
    assert jnp.allclose(loss_tiled, ref, rtol=1e-5, atol=1e-6), (loss_tiled, ref)

    # Default (auto) tile size path (single block covering the whole batch).
    loss_auto = jax.block_until_ready(label_smoothing_kl_div(x, t))
    assert jnp.allclose(loss_auto, ref, rtol=1e-5, atol=1e-6), (loss_auto, ref)

    print("KERNEL_OK")
</pallas_src>

<mosaic_0001>
module attributes {stable_mosaic.version = 11 : i64} {
  func.func @_kl_div_block_kernel(%arg0: i32, %arg1: memref<8x128xf32, #tpu.memory_space<vmem>>, %arg2: memref<8x128xf32, #tpu.memory_space<vmem>>, %arg3: memref<1x8x128xf32, #tpu.memory_space<vmem>>) attributes {dimension_semantics = [#tpu.dimension_semantics<parallel>], iteration_bounds = array<i64: 4>, scalar_prefetch = 0 : i64, scratch_operands = 0 : i64, tpu.core_type = #tpu.core_type<tc>, window_params = [{transform_indices = @transform_0, window_bounds = array<i64: 8, 128>}, {transform_indices = @transform_1, window_bounds = array<i64: 8, 128>}, {transform_indices = @transform_2, window_bounds = array<i64: 1, 8, 128>}]} {
    %c0 = arith.constant 0 : index
    %c0_0 = arith.constant 0 : index
    %0 = vector.load %arg1[%c0, %c0_0] : memref<8x128xf32, #tpu.memory_space<vmem>>, vector<8x128xf32>
    %c0_1 = arith.constant 0 : index
    %c0_2 = arith.constant 0 : index
    %1 = vector.load %arg2[%c0_1, %c0_2] : memref<8x128xf32, #tpu.memory_space<vmem>>, vector<8x128xf32>
    %2 = tpu.iota {dimensions = array<i32: 0>} : vector<8x1xi32>
    %c8_i32 = arith.constant 8 : i32
    %3 = arith.muli %arg0, %c8_i32 : i32
    %4 = vector.broadcast %3 : i32 to vector<8x1xi32>
    %5 = arith.addi %2, %4 : vector<8x1xi32>
    %c30_i32 = arith.constant 30 : i32
    %6 = vector.broadcast %c30_i32 : i32 to vector<8x1xi32>
    %7 = arith.cmpi slt, %5, %6 : vector<8x1xi32>
    %cst = arith.constant 0.000000e+00 : f32
    %8 = vector.shape_cast %7 : vector<8x1xi1> to vector<8x1xi1>
    %9 = vector.broadcast %8 : vector<8x1xi1> to vector<8x128xi1>
    %10 = vector.broadcast %cst : f32 to vector<8x128xf32>
    %11 = arith.select %9, %0, %10 : vector<8x128xi1>, vector<8x128xf32>
    %cst_3 = arith.constant 0.000000e+00 : f32
    %12 = vector.shape_cast %7 : vector<8x1xi1> to vector<8x1xi1>
    %13 = vector.broadcast %12 : vector<8x1xi1> to vector<8x128xi1>
    %14 = vector.broadcast %cst_3 : f32 to vector<8x128xf32>
    %15 = arith.select %13, %1, %14 : vector<8x128xi1>, vector<8x128xf32>
    %cst_4 = arith.constant dense<0xFF800000> : vector<8xf32>
    %16 = vector.multi_reduction <maximumf>, %11, %cst_4 [1] : vector<8x128xf32> to vector<8xf32>
    %17 = vector.shape_cast %16 : vector<8xf32> to vector<8x1xf32>
    %18 = vector.broadcast %17 : vector<8x1xf32> to vector<8x128xf32>
    %19 = arith.subf %11, %18 : vector<8x128xf32>
    %20 = math.exp %19 : vector<8x128xf32>
    %cst_5 = arith.constant dense<0.000000e+00> : vector<8xf32>
    %21 = vector.multi_reduction <add>, %20, %cst_5 [1] : vector<8x128xf32> to vector<8xf32>
    %22 = vector.shape_cast %21 : vector<8xf32> to vector<8x1xf32>
    %23 = math.log %22 : vector<8x1xf32>
    %24 = vector.broadcast %23 : vector<8x1xf32> to vector<8x128xf32>
    %25 = arith.subf %19, %24 : vector<8x128xf32>
    %cst_6 = arith.constant 0.000000e+00 : f32
    %26 = vector.broadcast %cst_6 : f32 to vector<8x128xf32>
    %27 = arith.cmpf ogt, %15, %26 : vector<8x128xf32>
    %cst_7 = arith.constant 1.000000e+00 : f32
    %28 = vector.broadcast %cst_7 : f32 to vector<8x128xf32>
    %29 = arith.select %27, %15, %28 : vector<8x128xi1>, vector<8x128xf32>
    %cst_8 = arith.constant 0.000000e+00 : f32
    %30 = vector.broadcast %cst_8 : f32 to vector<8x128xf32>
    %31 = arith.cmpf ogt, %15, %30 : vector<8x128xf32>
    %32 = math.log %29 : vector<8x128xf32>
    %33 = arith.mulf %15, %32 : vector<8x128xf32>
    %cst_9 = arith.constant 0.000000e+00 : f32
    %34 = vector.broadcast %cst_9 : f32 to vector<8x128xf32>
    %35 = arith.select %31, %33, %34 : vector<8x128xi1>, vector<8x128xf32>
    %36 = arith.mulf %15, %25 : vector<8x128xf32>
    %37 = arith.subf %35, %36 : vector<8x128xf32>
    %cst_10 = arith.constant 0.000000e+00 : f32
    %38 = vector.shape_cast %7 : vector<8x1xi1> to vector<8x1xi1>
    %39 = vector.broadcast %38 : vector<8x1xi1> to vector<8x128xi1>
    %40 = vector.broadcast %cst_10 : f32 to vector<8x128xf32>
    %41 = arith.select %39, %37, %40 : vector<8x128xi1>, vector<8x128xf32>
    %42 = vector.shape_cast %41 : vector<8x128xf32> to vector<1x8x128xf32>
    %cst_11 = arith.constant dense<0.000000e+00> : vector<8x128xf32>
    %43 = vector.multi_reduction <add>, %42, %cst_11 [0] : vector<1x8x128xf32> to vector<8x128xf32>
    %44 = vector.shape_cast %43 : vector<8x128xf32> to vector<1x8x128xf32>
    %c0_12 = arith.constant 0 : index
    %c0_13 = arith.constant 0 : index
    %c0_14 = arith.constant 0 : index
    %45 = vector.load %arg3[%c0_12, %c0_13, %c0_14] : memref<1x8x128xf32, #tpu.memory_space<vmem>>, vector<1x8x128xf32>
    tpu.vector_store %arg3[%c0_12, %c0_13, %c0_14], %44 {strides = array<i32>} : memref<1x8x128xf32, #tpu.memory_space<vmem>>, vector<1x8x128xf32>,
    return
  }
  func.func @transform_0(%arg0: i32) -> (i32, i32) {
    %c0_i32 = arith.constant 0 : i32
    %c0_i32_0 = arith.constant 0 : i32
    return %arg0, %c0_i32 : i32, i32
  }
  func.func @transform_1(%arg0: i32) -> (i32, i32) {
    %c0_i32 = arith.constant 0 : i32
    %c0_i32_0 = arith.constant 0 : i32
    return %arg0, %c0_i32 : i32, i32
  }
  func.func @transform_2(%arg0: i32) -> (i32, i32, i32) {
    %c0_i32 = arith.constant 0 : i32
    %c0_i32_0 = arith.constant 0 : i32
    %c0_i32_1 = arith.constant 0 : i32
    return %arg0, %c0_i32, %c0_i32_0 : i32, i32, i32
  }
}

</mosaic_0001>

<bundles_post_ra>
// kernel: tpu_custom_call.1
= control target key start
LH: loop header
LB: loop body
LE: loop exit
PB: predicated region body
PF: predicated region fallthrough
CT: control target
= control target key end

     0   :  { %7 = vsyncpa [#allocation3], 0  ;;  %s775_s0 = inlined_call_operand.hbm [shape: f32[30,128], index: 0, kind: input, shape index: {}]   ;;  %s776_s1 = inlined_call_operand.hbm [shape: f32[30,128], index: 1, kind: input, shape index: {}]   ;;  %s777_s2 = inlined_call_operand.hbm [shape: f32[4,8,128], index: 2, kind: output, shape index: {}]  }
   0x1   :  { %9 = vsyncpa [#allocation3 + $0x1], 0 }
   0x2   :  { %10 = vsyncpa [#allocation6], 0 }
   0x3   :  { %12 = vsyncpa [#allocation6 + $0x1], 0 }
   0x4   :  { %13 = vsyncpa [#allocation4], 0 }
   0x5   :  { %15 = vsyncpa [#allocation4 + $0x1], 0  ;;  %s559_s9 = smov 0   ;;  %s561_s10 = smov 0  }
   0x6   :  { %s563_s11 = smov 0   ;;  %s565_s12 = smov 0  }
   0x7 LB: > { %s580_s13 = sadd.s32 4294967295, %s539_s12   ;;  %s336_s14 = sadd.s32 4294967294, %s539_s12   ;;  %s539_s12 = sphi %s565_s12, %s795_s12   ;;  %s535_s11 = sphi %s563_s11, %s794_s11   ;;  %s531_s10 = sphi %s561_s10, %s793_s10   ;;  %s527_s9 = sphi %s559_s9, %s792_s9  }
   0x8   : > { %s584_s15 = sadd.s32 1, %s539_s12   ;;  %s28_s16 = sadd.s32 1, %s535_s11 }
   0x9   : > { %s25_s17 = ssub.s32 %s539_s12, %s584_s15  ;;  %p35_p0 = scmp.ne.s32.totalorder %s535_s11, %s531_s10 }
   0xa   : > { %p26_p1 = scmp.eq.s32.totalorder %s25_s17, 0  ;;  %p36_p2 = scmp.eq.s32.totalorder %s539_s12, 0 }
   0xb   : > { %p41_p3 = scmp.ne.s32.totalorder %s531_s10, %s527_s9  ;;  %p42_p4 = scmp.eq.s32.totalorder %s580_s13, 0 }
   0xc   : > { %s596_s18 = scalar_select %p26_p1, %s535_s11, %s28_s16  }
   0xd   : > { %p598_p5 = por %p36_p2, %p35_p0  ;;  %p602_p6 = por %p42_p4, %p41_p3 }
   0xe   : > { %p91_p7 = scmp.eq.s32.totalorder %s580_s13, 3  ;;  %p97_p8 = scmp.eq.s32.totalorder %s336_s14, 3 }
   0xf   : > { %s781_s20 = scalar_select %p602_p6, 1, 0 }
  0x10   : > { %p369_p9 = scmp.lt.s32.totalorder %s539_s12, 4  ;;  %p608_p10 = por %p91_p7, %p35_p0 }
  0x11   : > { %p612_p11 = por %p97_p8, %p41_p3  ;;  %s617_s23 = sand.u32 1, %s535_s11  }
  0x12   : > { %s782_s21 = scalar_select %p608_p10, 1, 0 }
  0x13   : > { %s783_s22 = scalar_select %p612_p11, 1, 0 }
  0x14   : > { %s340_s24 = sshll.u32 %s539_s12, 7  ;;  %s339_s25 = sshll.u32 %s617_s23, 3 }
  0x15   : > { %s626_s28 = scalar_lea.hbm %s775_s0, %s340_s24  ;;  %s121_s29 = scalar_lea.vmem [#allocation2], %s339_s25 }
  0x16   : > { %s128_s30 = sshll.u32 %s121_s29, 4  ;;  %p632_p12 = pnand %p369_p9, %p598_p5  ;;  %s636_s30 = int_to_ptr.vmem [resolvable:$true] %s128_s30 }
  0x17   : > { %s118_s4 = scalar_lea.sflag [#allocation3], %s617_s23  ;;  %s409_s5 = scalar_lea.hbm %s626_s28, 128 }
  0x18   : > { %p410_p1 = scmp.ne.s32.totalorder %s626_s28, %s409_s5  ;;  %p411_p2 = pneg %p632_p12 }
  0x19   : > { %s414_s8 = scalar_lea.hbm %s775_s0, 512  ;;  %p415_p5 = scmp.lt.u32.totalorder %s626_s28, %s775_s0 }
  0x1a   : > { %p412_p3 = pnand %p411_p2, %p410_p1  ;;  %p416_p7 = scmp.lt.u32.totalorder %s414_s8, %s409_s5 }
  0x1b   : > { %p418_p9 = scmp.lt.u32.totalorder %s409_s5, %s626_s28 }
  0x1c   : > { %p413_p4 = pneg %p412_p3  ;;  %p417_p8 = por %p416_p7, %p415_p5 }
  0x1e   : > { %p419_p13 = por %p418_p9, %p417_p8 }
  0x20   : > { %p420_p0 = pnand %p419_p13, %p413_p4 }
  0x22   : > { %423 = shalt.err (!%p420_p0)
}
  0x23   : > { %s424_s17 = scalar_lea.vmem %s636_s30, 128  ;;  %s541_s19 = smov [#allocation2]  }
  0x24   : > { %p425_p1 = scmp.ne.s32.totalorder %s636_s30, %s424_s17  ;;  %s429_s26 = sshll.u32 %s541_s19, 4  ;;  %s430_s26 = int_to_ptr.vmem [resolvable:$false] %s429_s26 }
  0x25   : > { %s431_s27 = scalar_lea.vmem %s430_s26, 256  ;;  %p432_p10 = scmp.lt.s32.totalorder %s636_s30, %s430_s26 }
  0x26   : > { %p427_p3 = pnand %p425_p1, %p411_p2  ;;  %p433_p5 = scmp.lt.s32.totalorder %s431_s27, %s424_s17 }
  0x28   : > { %p428_p11 = pneg %p427_p3  ;;  %p434_p7 = por %p433_p5, %p432_p10 }
  0x2a   : > { %p435_p8 = pnand %p434_p7, %p428_p11 }
  0x2c   : > { %438 = shalt.err (!%p435_p8)
}
  0x2d   : > { %361 = dma.hbm_to_vmem [thread:$0]  (!%p632_p12), %s626_s28, 128, %s636_s30, %s118_s4  }
  0x2e   : > { %p785_p13 = scmp.lt.s32.totalorder %s539_s12, 5  ;;  %p786_p0 = scmp.ge.s32.totalorder %s539_s12, 1 }
  0x2f   : > { %s679_s7 = scalar_lea.hbm %s776_s1, %s340_s24  ;;  %s139_s8 = scalar_lea.vmem [#allocation5], %s339_s25 }
  0x30   : > { %p670_p4 = pnand %p786_p0, %p785_p13  ;;  %s146_s14 = sshll.u32 %s139_s8, 4  ;;  %s147_s14 = int_to_ptr.vmem [resolvable:$true] %s146_s14 }
  0x31   : > { %s136_s28 = scalar_lea.sflag [#allocation6], %s617_s23  ;;  %s439_s30 = scalar_lea.hbm %s679_s7, 128 }
  0x32   : > { %s787_s29 = scalar_select %p670_p4, 1, 0 }
  0x33   : > { %p440_p10 = scmp.ne.s32.totalorder %s679_s7, %s439_s30  ;;  %s444_s24 = scalar_lea.hbm %s776_s1, 512 }
  0x34   : > { %p445_p1 = scmp.lt.u32.totalorder %s679_s7, %s776_s1  ;;  %p446_p3 = scmp.lt.u32.totalorder %s444_s24, %s439_s30 }
  0x35   : > { %p442_p11 = pnand %p440_p10, %p411_p2  ;;  %p448_p7 = scmp.lt.u32.totalorder %s439_s30, %s679_s7 }
  0x36   : > { %p447_p5 = por %p446_p3, %p445_p1 }
  0x37   : > { %p443_p9 = pneg %p442_p11 }
  0x38   : > { %p449_p8 = por %p448_p7, %p447_p5 }
  0x3a   : > { %p450_p13 = pnand %p449_p8, %p443_p9 }
  0x3c   : > { %453 = shalt.err (!%p450_p13)
}
  0x3d   : > { %s454_s23 = scalar_lea.vmem %s147_s14, 128  ;;  %s542_s25 = smov [#allocation5]  }
  0x3e   : > { %p455_p0 = scmp.ne.s32.totalorder %s147_s14, %s454_s23  ;;  %s459_s26 = sshll.u32 %s542_s25, 4  ;;  %s460_s26 = int_to_ptr.vmem [resolvable:$false] %s459_s26 }
  0x3f   : > { %s461_s27 = scalar_lea.vmem %s460_s26, 256  ;;  %p462_p6 = scmp.lt.s32.totalorder %s147_s14, %s460_s26 }
  0x40   : > { %p457_p10 = pnand %p455_p0, %p411_p2  ;;  %p463_p4 = scmp.lt.s32.totalorder %s461_s27, %s454_s23 }
  0x42   : > { %p458_p11 = pneg %p457_p10  ;;  %p464_p1 = por %p463_p4, %p462_p6 }
  0x44   : > { %p465_p3 = pnand %p464_p1, %p458_p11 }
  0x46   : > { %468 = shalt.err (!%p465_p3)
}
  0x47   : > { %364 = dma.hbm_to_vmem [thread:$0]  (!%p632_p12), %s679_s7, 128, %s147_s14, %s136_s28  }
  0x48   : > { %p788_p9 = scmp.ne.s32.totalorder %s787_s29, 0 }
  0x49   : > { %s706_s5 = sand.u32 (!%p788_p9), 1, %s531_s10   ;;  %p789_p6 = scmp.ne.s32.totalorder (!%p788_p9), %s781_s20, 0 }
  0x4a   : > { %155 = sbr.rel (%p788_p9) target bundleno = 425 (0x1a9), region = 28  ;;  %s709_s6 = sshll.u32 (!%p788_p9), %s706_s5, 3 }
  0x4b   : > { %s158_s8 = scalar_lea.sflag (!%p788_p9), [#allocation3], %s706_s5  ;;  %s161_s30 = scalar_lea.vmem (!%p788_p9), [#allocation2], %s709_s6 }
  0x51   : > { %514 = dma.done.wait (%p789_p6), %s158_s8, 128  }
  0x52   : > { %516 = vsyncadd (%p789_p6), %s158_s8, 4294967168  ;;  %s167_s3 = scalar_lea.sflag [#allocation6], %s706_s5  ;;  %s170_s29 = scalar_lea.vmem [#allocation5], %s709_s6 }
  0x53   : > { %518 = dma.done.wait (%p789_p6), %s167_s3, 128  }
  0x54   : > { %520 = vsyncadd (%p789_p6), %s167_s3, 4294967168  ;;  %v198_v0 = vlaneseq  ;;  %s347_s7 = sshll.u32 %s580_s13, 3  ;;  %v196_v4 = vld [vmem:[%s161_s30] sm:$0xff]  ;;  %v197_v10 = vld [vmem:[%s170_s29] sm:$0xff]  ;;  %s349_s20 = sshll.u32 %s580_s13, 7 }
  0x55   : > { %v201_v1 = vstv %s347_s7  ;;  %s195_s14 = scalar_lea.vmem [#allocation7], %s709_s6  ;;  %s731_s24 = scalar_lea.hbm %s777_s2, %s349_s20 }
  0x56   : > { %v199_v2 = vshrl.u32 %v198_v0, 7  ;;  %s243_s28 = sshll.u32 %s195_s14, 4  ;;  %s230_s17 = scalar_lea.sflag [#allocation4], %s706_s5  ;;  %s733_s28 = int_to_ptr.vmem [resolvable:$true] %s243_s28 }
  0x57   : > { %s469_s19 = scalar_lea.vmem %s733_s28, 128  ;;  %p790_p2 = scmp.ne.s32.totalorder %s782_s21, 0 }
  0x58   : > { %v202_v3 = vadd.s32 %v201_v1, %v199_v2  ;;  %p470_p12 = scmp.ne.s32.totalorder %s733_s28, %s469_s19  ;;  %s543_s13 = smov [#allocation7]  }
  0x59   : > { %s473_s23 = sshll.u32 %s543_s13, 4  ;;  %s474_s23 = int_to_ptr.vmem [resolvable:$false] %s473_s23 }
  0x5a   : > { %vm203_vm0 = vcmp.lt.s32.totalorder %v202_v3, 30  ;;  %p471_p4 = pnand %p470_p12, %p790_p2  ;;  %s475_s25 = scalar_lea.vmem %s474_s23, 256 }
  0x5b   : > { %v206_v5 = vsel %vm203_vm0, %v196_v4, 0.0  ;;  %v207_v11 = vsel %vm203_vm0, %v197_v10, 0.0  ;;  %p476_p7 = scmp.lt.s32.totalorder %s733_s28, %s474_s23  ;;  %p477_p8 = scmp.lt.s32.totalorder %s475_s25, %s469_s19 }
  0x5c   : > { %208 = vmax.xlane.f32.xlu0 %v206_v5  ;;  %vm218_vm1 = vcmp.gt.f32.partialorder %v207_v11, 0.0  ;;  %p472_p5 = pneg %p471_p4 }
  0x5d   : > { %v219_v12 = vsel %vm218_vm1, %v207_v11, 1.0  ;;  %p478_p13 = por %p477_p8, %p476_p7 }
  0x5f   : > { %p479_p0 = pnand %p478_p13, %p472_p5 }
  0xe9   : > { %v209_v6 = vpop.xlane.xlu0 %208 }
  0xea   : > { %v210_v7 = vsub.f32 %v206_v5, %v209_v6 }
  0xec   : > { %v211_v8 = vmul.f32 1.442695, %v210_v7 }
  0xee   : > { %403 = vpow2.f32 %v211_v8 }
  0xef   : > { %405 = vlog2.f32 %v219_v12 }
  0xf8   : > { %v404_v9 = vpop.eup %403 }
  0xf9   : > { %213 = vadd.xlane.f32.xlu0 %v404_v9  ;;  %v406_v14 = vpop.eup %405 }
  0xfa   : > { %v221_v15 = vmul.f32 0.6931472, %v406_v14 }
  0xfc   : > { %v222_v17 = vmul.f32 %v221_v15, %v207_v11 }
  0xfe   : > { %v223_v20 = vsel %vm218_vm1, %v222_v17, 0.0 }
 0x186   : > { %v214_v13 = vpop.xlane.xlu0 %213 }
 0x187   : > { %407 = vlog2.f32 %v214_v13 }
 0x191   : > { %v408_v16 = vpop.eup %407 }
 0x192   : > { %v216_v18 = vmul.f32 0.6931472, %v408_v16 }
 0x194   : > { %v217_v19 = vsub.f32 %v210_v7, %v216_v18 }
 0x196   : > { %v224_v21 = vmul.f32 %v217_v19, %v207_v11 }
 0x198   : > { %v225_v22 = vsub.f32 %v223_v20, %v224_v21 }
 0x19a   : > { %v226_v23 = vsel %vm203_vm0, %v225_v22, 0.0 }
 0x19b   : > { %228 = vst [vmem:[%s195_s14] sm:$0xff] %v226_v23 }
 0x19c   : > { %482 = shalt.err (!%p479_p0)
}
 0x19d   : > { %s483_s26 = scalar_lea.hbm %s731_s24, 128  ;;  %s487_s6 = scalar_lea.hbm %s777_s2, 512 }
 0x19e   : > { %p484_p10 = scmp.ne.s32.totalorder %s731_s24, %s483_s26  ;;  %p488_p3 = scmp.lt.u32.totalorder %s731_s24, %s777_s2 }
 0x19f   : > { %p489_p9 = scmp.lt.u32.totalorder %s487_s6, %s483_s26  ;;  %p491_p12 = scmp.lt.u32.totalorder %s483_s26, %s731_s24 }
 0x1a0   : > { %p485_p11 = pnand %p484_p10, %p790_p2 }
 0x1a1   : > { %p490_p6 = por %p489_p9, %p488_p3 }
 0x1a2   : > { %p486_p1 = pneg %p485_p11 }
 0x1a3   : > { %p492_p4 = por %p491_p12, %p490_p6 }
 0x1a5   : > { %p493_p5 = pnand %p492_p4, %p486_p1 }
 0x1a7   : > { %496 = shalt.err (!%p493_p5)
}
 0x1a8   : > { %356 = dma.vmem_to_hbm [thread:$0]  (%p790_p2), %s733_s28, 128, %s731_s24, %s230_s17  }
 0x1a9 PF: > { %p370_p7 = scmp.ge.s32.totalorder %s539_s12, 2  ;;  %s255_s3 = sand.u32 1, %s527_s9  }
 0x1aa   : > { %p791_p8 = scmp.ne.s32.totalorder %s783_s22, 0  ;;  %s256_s29 = scalar_lea.sflag [#allocation4], %s255_s3 }
 0x1ac   : > { %p366_p13 = pnand %p370_p7, %p791_p8 }
 0x1ae   : > { %522 = dma.done.wait (!%p366_p13), %s256_s29, 128  }
 0x1af   : > { %524 = vsyncadd (!%p366_p13), %s256_s29, 4294967168  ;;  %p18_p0 = scmp.ge.s32.totalorder %s584_s15, 6   ;;  %s792_s9 = smov %s531_s10 }
 0x1b0   : > { %s793_s10 = smov %s535_s11  ;;  %s794_s11 = smov %s596_s18 }
 0x1b1   : > { %s795_s12 = smov %s584_s15  ;;  %20 = sbr.rel (!%p18_p0) target bundleno = 7 (0x7), region = 86 }
 0x1b8   :  { %261 = vsyncpa [#allocation3], 1 }
 0x1b9   :  { %263 = vsyncpa [#allocation3 + $0x1], 1 }
 0x1ba   :  { %264 = vsyncpa [#allocation6], 1 }
 0x1bb   :  { %266 = vsyncpa [#allocation6 + $0x1], 1 }
 0x1bc   :  { %267 = vsyncpa [#allocation4], 1 }
 0x1bd   :  { %269 = vsyncpa [#allocation4 + $0x1], 1 }

</bundles_post_ra>
